<compile_context>
chip_gen: v6e
topology: v6e:2x2x1
jax: 0.10.0
libtpu: 0.0.40
codegen_flags: <defaults>
</compile_context>

<pallas_src>
import jax
import jax.numpy as jnp
from jax.experimental import pallas as pl
from jax.experimental.pallas import tpu as pltpu  # noqa: F401  (kept for TPU-specific tuning hooks)

EPS = 1e-5


def bn_relu_kernel(x_ref, params_ref, o_ref):
    # x_ref: (C, HW) f32   params_ref: (C, 2) f32  [:, 0] = gamma, [:, 1] = beta
    x = x_ref[...]
    _, hw = x.shape
    inv_hw = 1.0 / hw

    # Training-mode BatchNorm: biased mean/var per channel over H*W (N == 1).
    # Single pass over x for both moments (lane-axis reductions -> XLU).
    s = jnp.sum(x, axis=1, keepdims=True)               # (C, 1)
    ss = jnp.sum(x * x, axis=1, keepdims=True)          # (C, 1)
    mean = s * inv_hw
    var = jnp.maximum(ss * inv_hw - mean * mean, 0.0)   # guard tiny negative

    inv_std = jax.lax.rsqrt(var + EPS)                  # EUP slot (free-ish)

    # Fold normalization + affine into per-channel scale/bias:
    #   y = (x - mean) * inv_std * gamma + beta  ==  x * scale + bias
    gamma = params_ref[:, 0:1]                          # (C, 1)
    beta = params_ref[:, 1:2]                           # (C, 1)
    scale = gamma * inv_std
    bias = beta - mean * scale

    o_ref[...] = jnp.maximum(x * scale + bias, 0.0)     # ReLU


def batchnorm_relu(x_nchw, gamma, beta):
    """x_nchw: (N, C, H, W) float32; gamma, beta: (C,) float32.  N must be 1."""
    n, c, h, w = x_nchw.shape
    hw = h * w
    if n != 1:
        # TODO(synk): for N > 1 pass the (N, C, HW) view and reduce over (0, 2).
        raise NotImplementedError("batchnorm_relu kernel currently assumes N == 1")

    # Free views of contiguous NCHW data (no transpose / HBM round trip).
    x2d = x_nchw.reshape(c, hw).astype(jnp.float32)               # (C, HW)
    params = jnp.stack(
        [gamma.astype(jnp.float32), beta.astype(jnp.float32)], axis=1
    )                                                             # (C, 2)

    # No grid: whole arrays are brought into VMEM once and the kernel runs a
    # single time (minimum Pallas scaffolding for this latency-bound op).
    out2d = pl.pallas_call(
        bn_relu_kernel,
        out_shape=jax.ShapeDtypeStruct((c, hw), jnp.float32),
    )(x2d, params)

    # Free view back to NCHW.
    return out2d.reshape(n, c, h, w)


if __name__ == "__main__":
    key = jax.random.PRNGKey(0)
    kx, kg, kb = jax.random.split(key, 3)

    # Shapes implied by the PyTorch module: (1, 192, 14, 14).
    N, C, H, W = 1, 192, 14, 14
    x = jax.random.normal(kx, (N, C, H, W), dtype=jnp.float32)
    # PyTorch default affine params are ones/zeros; random values exercise the
    # affine path non-trivially.
    gamma = 1.0 + 0.1 * jax.random.normal(kg, (C,), dtype=jnp.float32)
    beta = 0.1 * jax.random.normal(kb, (C,), dtype=jnp.float32)

    out = batchnorm_relu(x, gamma, beta)
    out = jax.block_until_ready(out)

    # Reference: training-mode BatchNorm (biased var over N,H,W) + ReLU.
    mean = jnp.mean(x, axis=(0, 2, 3), keepdims=True)
    var = jnp.mean((x - mean) ** 2, axis=(0, 2, 3), keepdims=True)
    ref = (x - mean) * jax.lax.rsqrt(var + EPS)
    ref = ref * gamma.reshape(1, C, 1, 1) + beta.reshape(1, C, 1, 1)
    ref = jnp.maximum(ref, 0.0)

    assert out.shape == (N, C, H, W)
    assert jnp.max(jnp.abs(out - ref)) < 1e-4, "mismatch vs reference"
    print("KERNEL_OK")
</pallas_src>

<mosaic_0001>
module attributes {stable_mosaic.version = 11 : i64} {
  func.func @bn_relu_kernel(%arg0: memref<192x196xf32, #tpu.memory_space<vmem>>, %arg1: memref<192x2xf32, #tpu.memory_space<vmem>>, %arg2: memref<192x196xf32, #tpu.memory_space<vmem>>) attributes {dimension_semantics = [], scalar_prefetch = 0 : i64, scratch_operands = 0 : i64, tpu.core_type = #tpu.core_type<tc>} {
    %c0 = arith.constant 0 : index
    %c0_0 = arith.constant 0 : index
    %0 = vector.load %arg0[%c0, %c0_0] : memref<192x196xf32, #tpu.memory_space<vmem>>, vector<192x196xf32>
    %cst = arith.constant dense<0.000000e+00> : vector<192xf32>
    %1 = vector.multi_reduction <add>, %0, %cst [1] : vector<192x196xf32> to vector<192xf32>
    %2 = vector.shape_cast %1 : vector<192xf32> to vector<192x1xf32>
    %3 = arith.mulf %0, %0 : vector<192x196xf32>
    %cst_1 = arith.constant dense<0.000000e+00> : vector<192xf32>
    %4 = vector.multi_reduction <add>, %3, %cst_1 [1] : vector<192x196xf32> to vector<192xf32>
    %5 = vector.shape_cast %4 : vector<192xf32> to vector<192x1xf32>
    %cst_2 = arith.constant 0.00510204071 : f32
    %6 = vector.broadcast %cst_2 : f32 to vector<192x1xf32>
    %7 = arith.mulf %2, %6 : vector<192x1xf32>
    %cst_3 = arith.constant 0.00510204071 : f32
    %8 = vector.broadcast %cst_3 : f32 to vector<192x1xf32>
    %9 = arith.mulf %5, %8 : vector<192x1xf32>
    %10 = arith.mulf %7, %7 : vector<192x1xf32>
    %11 = arith.subf %9, %10 : vector<192x1xf32>
    %cst_4 = arith.constant 0.000000e+00 : f32
    %12 = vector.broadcast %cst_4 : f32 to vector<192x1xf32>
    %13 = arith.maximumf %11, %12 : vector<192x1xf32>
    %cst_5 = arith.constant 9.99999974E-6 : f32
    %14 = vector.broadcast %cst_5 : f32 to vector<192x1xf32>
    %15 = arith.addf %13, %14 : vector<192x1xf32>
    %16 = math.rsqrt %15 : vector<192x1xf32>
    %c0_6 = arith.constant 0 : index
    %c0_7 = arith.constant 0 : index
    %17 = vector.load %arg1[%c0_6, %c0_7] : memref<192x2xf32, #tpu.memory_space<vmem>>, vector<192x1xf32>
    %c0_8 = arith.constant 0 : index
    %c1 = arith.constant 1 : index
    %18 = vector.load %arg1[%c0_8, %c1] : memref<192x2xf32, #tpu.memory_space<vmem>>, vector<192x1xf32>
    %19 = arith.mulf %17, %16 : vector<192x1xf32>
    %20 = arith.mulf %7, %19 : vector<192x1xf32>
    %21 = arith.subf %18, %20 : vector<192x1xf32>
    %22 = vector.broadcast %19 : vector<192x1xf32> to vector<192x196xf32>
    %23 = arith.mulf %0, %22 : vector<192x196xf32>
    %24 = vector.broadcast %21 : vector<192x1xf32> to vector<192x196xf32>
    %25 = arith.addf %23, %24 : vector<192x196xf32>
    %cst_9 = arith.constant 0.000000e+00 : f32
    %26 = vector.broadcast %cst_9 : f32 to vector<192x196xf32>
    %27 = arith.maximumf %25, %26 : vector<192x196xf32>
    %c0_10 = arith.constant 0 : index
    %c0_11 = arith.constant 0 : index
    %28 = vector.load %arg2[%c0_10, %c0_11] : memref<192x196xf32, #tpu.memory_space<vmem>>, vector<192x196xf32>
    tpu.vector_store %arg2[%c0_10, %c0_11], %27 {strides = array<i32>} : memref<192x196xf32, #tpu.memory_space<vmem>>, vector<192x196xf32>,
    return
  }
}

</mosaic_0001>

<bundles_post_ra>
// kernel: tpu_custom_call.1
= control target key start
LH: loop header
LB: loop body
LE: loop exit
PB: predicated region body
PF: predicated region fallthrough
CT: control target
= control target key end

     0   :  { %7 = vsyncpa [#allocation3], 0  ;;  %s2117_s0 = inlined_call_operand.hbm [shape: f32[192,196], index: 0, kind: input, shape index: {}]   ;;  %s2118_s1 = inlined_call_operand.vmem [shape: f32[192,2], index: 1, kind: input, shape index: {}]   ;;  %s2119_s2 = inlined_call_operand.hbm [shape: f32[192,196], index: 2, kind: output, shape index: {}]  }
   0x1   :  { %8 = vsyncpa [#allocation4], 0  ;;  %s1275_s9 = smov [#allocation2]  }
   0x2   :  { %s14_s10 = sshll.u32 %s1275_s9, 4  ;;  %s15_s10 = int_to_ptr.vmem [resolvable:$true] %s14_s10 }
   0x3   :  { %s1239_s11 = scalar_lea.vmem %s15_s10, 6144  ;;  %p1244_p1 = scmp.lt.s32.totalorder %s15_s10, %s15_s10 }
   0x4   :  { %p1240_p0 = scmp.ne.s32.totalorder %s15_s10, %s1239_s11  ;;  %p1245_p2 = scmp.lt.s32.totalorder %s1239_s11, %s1239_s11 }
   0x6   :  { %p1246_p3 = por %p1245_p2, %p1244_p1 }
   0x8   :  { %p1247_p4 = pnand %p1246_p3, %p1240_p0 }
   0xa   :  { %1250 = shalt.err (!%p1247_p4)
}
   0xb   :  { %s1276_s12 = smov 256   ;;  %s1277_s13 = smov 16  }
   0xc   :  { %20 = dma.hbm_to_vmem [thread:$0]  %s2117_s0, 6144, %s15_s10, [#allocation3], %s1276_s12, %s1276_s12, %s1277_s13  }
   0xd   :  { %1271 = dma.done.wait [#allocation3], 6144  }
   0xe   :  { %1272 = vsyncadd [#allocation3], 4294961152  ;;  %vm74_vm0 = vcmask 556032   ;;  %v1303_v0 = vld [vmem:[#allocation2 + $0x20] sm:$0xff]  ;;  %v1305_v1 = vld [vmem:[#allocation2 + $0x28] sm:$0xff]  ;;  %s1279_s5 = smov 1  }
   0xf   :  { %v1307_v2 = vld [vmem:[#allocation2] sm:$0xff]  ;;  %v83_v3 = vsel %vm74_vm0, %v1305_v1, 0.0  ;;  %v1311_v4 = vld [vmem:[#allocation2 + $0x8] sm:$0xff]  ;;  %v1313_v5 = vld [vmem:[#allocation2 + $0x30] sm:$0xff] }
  0x10   :  { %v1315_v6 = vld [vmem:[#allocation2 + $0x38] sm:$0xff]  ;;  %v84_v7 = vadd.f32 %v83_v3, %v1303_v0  ;;  %v75_v8 = vsel %vm74_vm0, %v1311_v4, 0.0  ;;  %v1322_v10 = vld [vmem:[#allocation2 + $0x10] sm:$0xff]  ;;  %v1331_v15 = vld [vmem:[#allocation2 + $0x48] sm:$0xff] }
  0x11   :  { %v87_v9 = vsel %vm74_vm0, %v1315_v6, 0.0  ;;  %v1324_v11 = vld [vmem:[#allocation2 + $0x18] sm:$0xff]  ;;  %v76_v12 = vadd.f32 %v75_v8, %v1307_v2  ;;  %v1335_v18 = vld [vmem:[#allocation2 + $0x50] sm:$0xff]  ;;  %v1339_v20 = vld [vmem:[#allocation2 + $0x40] sm:$0xff]  ;;  %v91_v21 = vsel %vm74_vm0, %v1331_v15, 0.0 }
  0x12   :  { %v79_v13 = vsel %vm74_vm0, %v1324_v11, 0.0  ;;  %v1329_v14 = vld [vmem:[#allocation2 + $0x58] sm:$0xff]  ;;  %85 = vadd.xlane.f32.xlu1 %v84_v7  ;;  %v88_v16 = vadd.f32 %v87_v9, %v1313_v5  ;;  %v1345_v23 = vld [vmem:[#allocation2 + $0x68] sm:$0xff]  ;;  %v92_v25 = vadd.f32 %v91_v21, %v1339_v20  ;;  %v1349_v26 = vld [vmem:[#allocation2 + $0x70] sm:$0xff] }
  0x13   :  { %77 = vadd.xlane.f32.xlu0 %v76_v12  ;;  %v80_v17 = vadd.f32 %v79_v13, %v1322_v10  ;;  %v95_v19 = vsel %vm74_vm0, %v1329_v14, 0.0  ;;  %v1343_v22 = vld [vmem:[#allocation2 + $0x78] sm:$0xff]  ;;  %v1353_v28 = vld [vmem:[#allocation2 + $0x60] sm:$0xff]  ;;  %v99_v29 = vsel %vm74_vm0, %v1345_v23, 0.0  ;;  %v1359_v31 = vld [vmem:[#allocation2 + $0x88] sm:$0xff] }
  0x14   :  { %v96_v24 = vadd.f32 %v95_v19, %v1335_v18  ;;  %v103_v27 = vsel %vm74_vm0, %v1343_v22, 0.0  ;;  %v1357_v30 = vld [vmem:[#allocation2 + $0x98] sm:$0xff]  ;;  %v100_v33 = vadd.f32 %v99_v29, %v1353_v28  ;;  %v1363_v34 = vld [vmem:[#allocation2 + $0x90] sm:$0xff]  ;;  %v1367_v36 = vld [vmem:[#allocation2 + $0x80] sm:$0xff]  ;;  %v107_v37 = vsel %vm74_vm0, %v1359_v31, 0.0 }
  0x15   :  { %v104_v32 = vadd.f32 %v103_v27, %v1349_v26  ;;  %v111_v35 = vsel %vm74_vm0, %v1357_v30, 0.0  ;;  %v1371_v38 = vld [vmem:[#allocation2 + $0xb8] sm:$0xff]  ;;  %v1373_v39 = vld [vmem:[#allocation2 + $0xa8] sm:$0xff]  ;;  %v108_v41 = vadd.f32 %v107_v37, %v1367_v36  ;;  %v1377_v42 = vld [vmem:[#allocation2 + $0xb0] sm:$0xff] }
  0x16   :  { %89 = vadd.xlane.f32.xlu1 %v88_v16  ;;  %v112_v40 = vadd.f32 %v111_v35, %v1363_v34  ;;  %v119_v43 = vsel %vm74_vm0, %v1371_v38, 0.0  ;;  %v1381_v44 = vld [vmem:[#allocation2 + $0xa0] sm:$0xff]  ;;  %v115_v45 = vsel %vm74_vm0, %v1373_v39, 0.0  ;;  %v1385_v46 = vld [vmem:[#allocation2 + $0xd8] sm:$0xff]  ;;  %v1387_v47 = vld [vmem:[#allocation2 + $0xc8] sm:$0xff] }
  0x17   :  { %81 = vadd.xlane.f32.xlu0 %v80_v17  ;;  %v120_v48 = vadd.f32 %v119_v43, %v1377_v42  ;;  %v116_v49 = vadd.f32 %v115_v45, %v1381_v44  ;;  %v1391_v50 = vld [vmem:[#allocation2 + $0xd0] sm:$0xff]  ;;  %v127_v51 = vsel %vm74_vm0, %v1385_v46, 0.0  ;;  %v1395_v52 = vld [vmem:[#allocation2 + $0xc0] sm:$0xff]  ;;  %v123_v53 = vsel %vm74_vm0, %v1387_v47, 0.0  ;;  %v1399_v54 = vld [vmem:[#allocation2 + $0xf8] sm:$0xff] }
  0x18   :  { %v1401_v55 = vld [vmem:[#allocation2 + $0xe8] sm:$0xff]  ;;  %v128_v56 = vadd.f32 %v127_v51, %v1391_v50  ;;  %v124_v57 = vadd.f32 %v123_v53, %v1395_v52  ;;  %v1405_v58 = vld [vmem:[#allocation2 + $0xf0] sm:$0xff]  ;;  %v135_v59 = vsel %vm74_vm0, %v1399_v54, 0.0  ;;  %v1409_v60 = vld [vmem:[#allocation2 + $0xe0] sm:$0xff] }
  0x19   :  { %v131_v61 = vsel %vm74_vm0, %v1401_v55, 0.0  ;;  %v1413_v62 = vld [vmem:[#allocation2 + $0x118] sm:$0xff]  ;;  %v1415_v63 = vld [vmem:[#allocation2 + $0x108] sm:$0xff]  ;;  %v136_v3 = vadd.f32 %v135_v59, %v1405_v58  ;;  %v1419_v8 = vld [vmem:[#allocation2 + $0x110] sm:$0xff]  ;;  %v174_v59 = vmul.f32 %v1324_v11, %v1324_v11  ;;  %v171_v11 = vmul.f32 %v1307_v2, %v1307_v2 }
  0x1a   :  { %97 = vadd.xlane.f32.xlu1 %v96_v24  ;;  %v132_v7 = vadd.f32 %v131_v61, %v1409_v60  ;;  %v143_v9 = vsel %vm74_vm0, %v1413_v62, 0.0  ;;  %v1423_v12 = vld [vmem:[#allocation2 + $0x100] sm:$0xff]  ;;  %v139_v13 = vsel %vm74_vm0, %v1415_v63, 0.0  ;;  %v1427_v16 = vld [vmem:[#allocation2 + $0x138] sm:$0xff]  ;;  %v1429_v17 = vld [vmem:[#allocation2 + $0x128] sm:$0xff]  ;;  %v175_v2 = vmul.f32 %v1303_v0, %v1303_v0 }
  0x1b   :  { %93 = vadd.xlane.f32.xlu0 %v92_v25  ;;  %v144_v19 = vadd.f32 %v143_v9, %v1419_v8  ;;  %v140_v21 = vadd.f32 %v139_v13, %v1423_v12  ;;  %v1433_v24 = vld [vmem:[#allocation2 + $0x130] sm:$0xff]  ;;  %v151_v25 = vsel %vm74_vm0, %v1427_v16, 0.0  ;;  %v1437_v27 = vld [vmem:[#allocation2 + $0x120] sm:$0xff]  ;;  %v147_v29 = vsel %vm74_vm0, %v1429_v17, 0.0 }
  0x1c   :  { %v152_v35 = vadd.f32 %v151_v25, %v1433_v24  ;;  %v148_v37 = vadd.f32 %v147_v29, %v1437_v27  ;;  %v1451_v43 = vld [vmem:[#allocation2 + $0x140] sm:$0xff]  ;;  %v173_v13 = vmul.f32 %v1322_v10, %v1322_v10  ;;  %v178_v25 = vmul.f32 %v1315_v6, %v1315_v6 }
  0x1d   :  { %v1467_v61 = vld [vmem:[#allocation2 + $0x160] sm:$0xff]  ;;  %v177_v10 = vmul.f32 %v1313_v5, %v1313_v5  ;;  %v182_v6 = vmul.f32 %v1329_v14, %v1329_v14  ;;  %v181_v5 = vmul.f32 %v1335_v18, %v1335_v18  ;;  %v179_v0 = vmul.f32 %v1339_v20, %v1339_v20 }
  0x1e   :  { %105 = vadd.xlane.f32.xlu1 %v104_v32  ;;  %v1441_v32 = vld [vmem:[#allocation2 + $0x158] sm:$0xff]  ;;  %v186_v14 = vmul.f32 %v1343_v22, %v1343_v22  ;;  %v185_v18 = vmul.f32 %v1349_v26, %v1349_v26  ;;  %v183_v20 = vmul.f32 %v1353_v28, %v1353_v28  ;;  %v190_v22 = vmul.f32 %v1357_v30, %v1357_v30 }
  0x1f   :  { %101 = vadd.xlane.f32.xlu0 %v100_v33  ;;  %v1443_v33 = vld [vmem:[#allocation2 + $0x148] sm:$0xff]  ;;  %v189_v26 = vmul.f32 %v1363_v34, %v1363_v34  ;;  %v187_v28 = vmul.f32 %v1367_v36, %v1367_v36  ;;  %v194_v30 = vmul.f32 %v1371_v38, %v1371_v38  ;;  %v193_v34 = vmul.f32 %v1377_v42, %v1377_v42 }
  0x20   :  { %v155_v45 = vsel %vm74_vm0, %v1443_v33, 0.0  ;;  %v191_v36 = vmul.f32 %v1381_v44, %v1381_v44  ;;  %v198_v38 = vmul.f32 %v1385_v46, %v1385_v46  ;;  %v197_v42 = vmul.f32 %v1391_v50, %v1391_v50 }
  0x21   :  { %v156_v53 = vadd.f32 %v155_v45, %v1451_v43  ;;  %v195_v44 = vmul.f32 %v1395_v52, %v1395_v52  ;;  %v202_v46 = vmul.f32 %v1399_v54, %v1399_v54  ;;  %v201_v50 = vmul.f32 %v1405_v58, %v1405_v58 }
  0x22   :  { %113 = vadd.xlane.f32.xlu1 %v112_v40  ;;  %v1447_v40 = vld [vmem:[#allocation2 + $0x150] sm:$0xff]  ;;  %v199_v52 = vmul.f32 %v1409_v60, %v1409_v60  ;;  %v206_v54 = vmul.f32 %v1413_v62, %v1413_v62  ;;  %v205_v58 = vmul.f32 %v1419_v8, %v1419_v8  ;;  %v203_v60 = vmul.f32 %v1423_v12, %v1423_v12 }
  0x23   :  { %109 = vadd.xlane.f32.xlu0 %v108_v41  ;;  %v159_v41 = vsel %vm74_vm0, %v1441_v32, 0.0  ;;  %v210_v62 = vmul.f32 %v1427_v16, %v1427_v16  ;;  %v209_v8 = vmul.f32 %v1433_v24, %v1433_v24  ;;  %v207_v12 = vmul.f32 %v1437_v27, %v1437_v27 }
  0x24   :  { %v160_v51 = vadd.f32 %v159_v41, %v1447_v40  ;;  %v231_v41 = vsel %vm74_vm0, %v178_v25, 0.0  ;;  %v214_v16 = vmul.f32 %v1441_v32, %v1441_v32  ;;  %v213_v24 = vmul.f32 %v1447_v40, %v1447_v40 }
  0x26   :  { %121 = vadd.xlane.f32.xlu1 %v120_v48  ;;  %v1455_v48 = vld [vmem:[#allocation2 + $0x178] sm:$0xff]  ;;  %v303_v27 = vsel %vm74_vm0, %v214_v16, 0.0 }
  0x27   :  { %117 = vadd.xlane.f32.xlu0 %v116_v49  ;;  %v1457_v49 = vld [vmem:[#allocation2 + $0x168] sm:$0xff]  ;;  %v218_v32 = vmul.f32 %v1455_v48, %v1455_v48  ;;  %v304_v40 = vadd.f32 %v303_v27, %v213_v24 }
  0x2a   :  { %129 = vadd.xlane.f32.xlu1 %v128_v56  ;;  %v1461_v56 = vld [vmem:[#allocation2 + $0x170] sm:$0xff] }
  0x2b   :  { %125 = vadd.xlane.f32.xlu0 %v124_v57  ;;  %v167_v57 = vsel %vm74_vm0, %v1455_v48, 0.0  ;;  %v215_v48 = vmul.f32 %v1467_v61, %v1467_v61 }
  0x2c   :  { %v168_v9 = vadd.f32 %v167_v57, %v1461_v56  ;;  %v239_v57 = vsel %vm74_vm0, %v182_v6, 0.0 }
  0x2e   :  { %137 = vadd.xlane.f32.xlu1 %v136_v3  ;;  %v163_v3 = vsel %vm74_vm0, %v1457_v49, 0.0 }
  0x2f   :  { %133 = vadd.xlane.f32.xlu0 %v132_v7  ;;  %v172_v7 = vmul.f32 %v1311_v4, %v1311_v4  ;;  %v176_v4 = vmul.f32 %v1305_v1, %v1305_v1  ;;  %v180_v1 = vmul.f32 %v1331_v15, %v1331_v15  ;;  %v184_v15 = vmul.f32 %v1345_v23, %v1345_v23 }
  0x30   :  { %v188_v23 = vmul.f32 %v1359_v31, %v1359_v31  ;;  %v192_v31 = vmul.f32 %v1373_v39, %v1373_v39  ;;  %v196_v39 = vmul.f32 %v1387_v47, %v1387_v47  ;;  %v200_v47 = vmul.f32 %v1401_v55, %v1401_v55 }
  0x31   :  { %v219_v29 = vsel %vm74_vm0, %v172_v7, 0.0  ;;  %v227_v45 = vsel %vm74_vm0, %v176_v4, 0.0  ;;  %v204_v55 = vmul.f32 %v1415_v63, %v1415_v63  ;;  %v208_v63 = vmul.f32 %v1429_v17, %v1429_v17 }
  0x32   :  { %145 = vadd.xlane.f32.xlu1 %v144_v19  ;;  %v164_v19 = vadd.f32 %v163_v3, %v1467_v61  ;;  %v240_v3 = vadd.f32 %v239_v57, %v181_v5  ;;  %v251_v25 = vsel %vm74_vm0, %v188_v23, 0.0  ;;  %v267_v6 = vsel %vm74_vm0, %v196_v39, 0.0 }
  0x33   :  { %141 = vadd.xlane.f32.xlu0 %v140_v21  ;;  %v223_v21 = vsel %vm74_vm0, %v174_v59, 0.0  ;;  %v235_v59 = vsel %vm74_vm0, %v180_v1, 0.0  ;;  %v252_v4 = vadd.f32 %v251_v25, %v187_v28  ;;  %v268_v1 = vadd.f32 %v267_v6, %v195_v44 }
  0x34   :  { %v236_v7 = vadd.f32 %v235_v59, %v179_v0  ;;  %v275_v5 = vsel %vm74_vm0, %v200_v47, 0.0  ;;  %v287_v0 = vsel %vm74_vm0, %v206_v54, 0.0  ;;  %v212_v17 = vmul.f32 %v1443_v33, %v1443_v33 }
  0x35   :  { %v276_v57 = vadd.f32 %v275_v5, %v199_v52  ;;  %v288_v59 = vadd.f32 %v287_v0, %v205_v58  ;;  %v216_v33 = vmul.f32 %v1457_v49, %v1457_v49 }
  0x36   :  { %153 = vadd.xlane.f32.xlu1 %v152_v35  ;;  %v224_v35 = vadd.f32 %v223_v21, %v173_v13  ;;  %v243_v13 = vsel %vm74_vm0, %v184_v15, 0.0 }
  0x37   :  { %149 = vadd.xlane.f32.xlu0 %v148_v37  ;;  %v220_v37 = vadd.f32 %v219_v29, %v171_v11  ;;  %v244_v21 = vadd.f32 %v243_v13, %v183_v20  ;;  %v255_v11 = vsel %vm74_vm0, %v190_v22, 0.0  ;;  %v299_v22 = vsel %vm74_vm0, %v212_v17, 0.0 }
  0x38   :  { %v256_v29 = vadd.f32 %v255_v11, %v189_v26  ;;  %v1278_v13 = vmov 0   ;;  %v307_v26 = vsel %vm74_vm0, %v216_v33, 0.0 }
  0x39   :  { %1132 = vset.pattern.permute.xlu1 %v1278_v13  ;;  %1131 = vset.pattern.permute.xlu0 %v1278_v13  ;;  %v308_v49 = vadd.f32 %v307_v26, %v215_v48 }
  0x3a   :  { %161 = vadd.xlane.f32.xlu1 %v160_v51  ;;  %v232_v51 = vadd.f32 %v231_v41, %v177_v10  ;;  %v259_v10 = vsel %vm74_vm0, %v192_v31, 0.0 }
  0x3b   :  { %157 = vadd.xlane.f32.xlu0 %v156_v53  ;;  %v228_v53 = vadd.f32 %v227_v45, %v175_v2  ;;  %v260_v41 = vadd.f32 %v259_v10, %v191_v36  ;;  %v271_v2 = vsel %vm74_vm0, %v198_v38, 0.0 }
  0x3c   :  { %v272_v45 = vadd.f32 %v271_v2, %v197_v42 }
  0x3e   :  { %169 = vadd.xlane.f32.xlu1 %v168_v9  ;;  %v247_v9 = vsel %vm74_vm0, %v186_v14, 0.0  ;;  %v283_v14 = vsel %vm74_vm0, %v204_v55, 0.0 }
  0x3f   :  { %165 = vadd.xlane.f32.xlu0 %v164_v19  ;;  %v248_v19 = vadd.f32 %v247_v9, %v185_v18  ;;  %v284_v15 = vadd.f32 %v283_v14, %v203_v60  ;;  %v291_v18 = vsel %vm74_vm0, %v208_v63, 0.0  ;;  %v211_v9 = vmul.f32 %v1451_v43, %v1451_v43 }
  0x40   :  { %v292_v20 = vadd.f32 %v291_v18, %v207_v12  ;;  %v217_v43 = vmul.f32 %v1461_v56, %v1461_v56 }
  0x41   :  { %v300_v23 = vadd.f32 %v299_v22, %v211_v9 }
  0x42   :  { %225 = vadd.xlane.f32.xlu1 %v224_v35  ;;  %v263_v35 = vsel %vm74_vm0, %v194_v30, 0.0 }
  0x43   :  { %221 = vadd.xlane.f32.xlu0 %v220_v37  ;;  %v264_v37 = vadd.f32 %v263_v35, %v193_v34 }
  0x46   :  { %233 = vadd.xlane.f32.xlu1 %v232_v51  ;;  %v279_v51 = vsel %vm74_vm0, %v202_v46, 0.0 }
  0x47   :  { %229 = vadd.xlane.f32.xlu0 %v228_v53  ;;  %v280_v53 = vadd.f32 %v279_v51, %v201_v50 }
  0x4a   :  { %241 = vadd.xlane.f32.xlu1 %v240_v3  ;;  %v295_v3 = vsel %vm74_vm0, %v210_v62, 0.0 }
  0x4b   :  { %237 = vadd.xlane.f32.xlu0 %v236_v7  ;;  %v296_v7 = vadd.f32 %v295_v3, %v209_v8 }
  0x4e   :  { %249 = vadd.xlane.f32.xlu1 %v248_v19  ;;  %v311_v19 = vsel %vm74_vm0, %v218_v32, 0.0 }
  0x4f   :  { %245 = vadd.xlane.f32.xlu0 %v244_v21  ;;  %v312_v21 = vadd.f32 %v311_v19, %v217_v43 }
  0x52   :  { %257 = vadd.xlane.f32.xlu1 %v256_v29 }
  0x53   :  { %253 = vadd.xlane.f32.xlu0 %v252_v4 }
  0x56   :  { %265 = vadd.xlane.f32.xlu1 %v264_v37 }
  0x57   :  { %261 = vadd.xlane.f32.xlu0 %v260_v41 }
  0x5a   :  { %273 = vadd.xlane.f32.xlu1 %v272_v45 }
  0x5b   :  { %269 = vadd.xlane.f32.xlu0 %v268_v1 }
  0x5e   :  { %281 = vadd.xlane.f32.xlu1 %v280_v53 }
  0x5f   :  { %277 = vadd.xlane.f32.xlu0 %v276_v57 }
  0x62   :  { %289 = vadd.xlane.f32.xlu1 %v288_v59 }
  0x63   :  { %285 = vadd.xlane.f32.xlu0 %v284_v15 }
  0x66   :  { %297 = vadd.xlane.f32.xlu1 %v296_v7 }
  0x67   :  { %293 = vadd.xlane.f32.xlu0 %v292_v20 }
  0x6a   :  { %305 = vadd.xlane.f32.xlu1 %v304_v40 }
  0x6b   :  { %301 = vadd.xlane.f32.xlu0 %v300_v23 }
  0x6e   :  { %313 = vadd.xlane.f32.xlu1 %v312_v21 }
  0x6f   :  { %309 = vadd.xlane.f32.xlu0 %v308_v49 }
  0x9b   :  { %v86_v11 = vpop.xlane.xlu1 %85 }
  0x9c   :  { %v78_v28 = vpop.xlane.xlu0 %77  ;;  %v1631_v53 = vmul.f32 0.0051020407, %v86_v11 }
  0x9d   :  { %v1625_v1 = vmul.f32 0.0051020407, %v78_v28 }
  0x9e   :  { %v365_v3 = vmul.f32 %v1631_v53, %v1631_v53 }
  0x9f   :  { %v90_v30 = vpop.xlane.xlu1 %89  ;;  %v363_v58 = vmul.f32 %v1625_v1, %v1625_v1 }
  0xa0   :  { %v82_v25 = vpop.xlane.xlu0 %81  ;;  %v1627_v52 = vmul.f32 0.0051020407, %v90_v30 }
  0xa1   :  { %v1621_v45 = vmul.f32 0.0051020407, %v82_v25 }
  0xa2   :  { %v366_v63 = vmul.f32 %v1627_v52, %v1627_v52 }
  0xa3   :  { %v98_v56 = vpop.xlane.xlu1 %97  ;;  %v364_v54 = vmul.f32 %v1621_v45, %v1621_v45 }
  0xa4   :  { %v94_v31 = vpop.xlane.xlu0 %93  ;;  %v1635_v60 = vmul.f32 0.0051020407, %v98_v56 }
  0xa5   :  { %v1641_v12 = vmul.f32 0.0051020407, %v94_v31 }
  0xa6   :  { %v368_v24 = vmul.f32 %v1635_v60, %v1635_v60 }
  0xa7   :  { %v106_v29 = vpop.xlane.xlu1 %105  ;;  %v367_v43 = vmul.f32 %v1641_v12, %v1641_v12 }
  0xa8   :  { %v102_v34 = vpop.xlane.xlu0 %101  ;;  %v1645_v9 = vmul.f32 0.0051020407, %v106_v29 }
  0xa9   :  { %v1647_v22 = vmul.f32 0.0051020407, %v102_v34 }
  0xaa   :  { %v370_v21 = vmul.f32 %v1645_v9, %v1645_v9 }
  0xab   :  { %v1591_v4 = vpop.xlane.xlu1 %113  ;;  %v369_v30 = vmul.f32 %v1647_v22, %v1647_v22 }
  0xac   :  { %v1593_v35 = vpop.xlane.xlu0 %109 }
  0xad   :  { %v1656_v29 = vmul.f32 0.0051020407, %v1593_v35 }
  0xaf   :  { %v1595_v61 = vpop.xlane.xlu1 %121 }
  0xb0   :  { %v1597_v36 = vpop.xlane.xlu0 %117 }
  0xb3   :  { %v1599_v38 = vpop.xlane.xlu1 %129 }
  0xb4   :  { %v1601_v10 = vpop.xlane.xlu0 %125 }
  0xb7   :  { %v1603_v39 = vpop.xlane.xlu1 %137 }
  0xb8   :  { %v1605_v37 = vpop.xlane.xlu0 %133 }
  0xbb   :  { %v1607_v42 = vpop.xlane.xlu1 %145 }
  0xbc   :  { %v1609_v41 = vpop.xlane.xlu0 %141 }
  0xbf   :  { %v1611_v2 = vpop.xlane.xlu1 %153 }
  0xc0   :  { %v1613_v44 = vpop.xlane.xlu0 %149 }
  0xc3   :  { %v1615_v46 = vpop.xlane.xlu1 %161 }
  0xc4   :  { %v1617_v6 = vpop.xlane.xlu0 %157 }
  0xc7   :  { %v1619_v47 = vpop.xlane.xlu1 %169 }
  0xc8   :  { %v1623_v50 = vpop.xlane.xlu0 %165 }
  0xcb   :  { %v226_v51 = vpop.xlane.xlu1 %225 }
  0xcc   :  { %v340_v5 = vmul.f32 0.0051020407, %v226_v51  ;;  %v222_v55 = vpop.xlane.xlu0 %221 }
  0xcd   :  { %v339_v57 = vmul.f32 0.0051020407, %v222_v55 }
  0xce   :  { %v388_v0 = vsub.f32 %v340_v5, %v364_v54 }
  0xcf   :  { %v387_v62 = vsub.f32 %v339_v57, %v363_v58  ;;  %v234_v14 = vpop.xlane.xlu1 %233 }
  0xd0   :  { %v412_v59 = vmax.f32 %v388_v0, 0.0  ;;  %v342_v8 = vmul.f32 0.0051020407, %v234_v14  ;;  %v230_v15 = vpop.xlane.xlu0 %229  ;;  %v1659_v0 = vmul.f32 0.0051020407, %v1597_v36 }
  0xd1   :  { %v411_v16 = vmax.f32 %v387_v62, 0.0  ;;  %v341_v18 = vmul.f32 0.0051020407, %v230_v15 }
  0xd2   :  { %v436_v17 = vadd.f32 1e-05, %v412_v59  ;;  %v390_v7 = vsub.f32 %v342_v8, %v366_v63  ;;  %v371_v63 = vmul.f32 %v1656_v29, %v1656_v29  ;;  %v373_v36 = vmul.f32 %v1659_v0, %v1659_v0 }
  0xd3   :  { %v435_v20 = vadd.f32 1e-05, %v411_v16  ;;  %v389_v27 = vsub.f32 %v341_v18, %v365_v3  ;;  %v242_v32 = vpop.xlane.xlu1 %241  ;;  %v1666_v18 = vld [vmem:[%s2118_s1 + $0x8] sm:$0xff] }
  0xd4   :  { %1135 = vrsqrt.f32 %v436_v17  ;;  %v414_v33 = vmax.f32 %v390_v7, 0.0  ;;  %v344_v13 = vmul.f32 0.0051020407, %v242_v32  ;;  %v238_v40 = vpop.xlane.xlu0 %237  ;;  %v1673_v7 = vld [vmem:[%s2118_s1] sm:$0xff] }
  0xd5   :  { %1137 = vrsqrt.f32 %v435_v20  ;;  %v413_v23 = vmax.f32 %v389_v27, 0.0  ;;  %v343_v19 = vmul.f32 0.0051020407, %v238_v40  ;;  %v1676_v20 = vmul.f32 0.0051020407, %v1601_v10 }
  0xd6   :  { %v438_v48 = vadd.f32 1e-05, %v414_v33  ;;  %v392_v26 = vsub.f32 %v344_v13, %v368_v24  ;;  %v1690_v10 = vmul.f32 0.0051020407, %v1591_v4 }
  0xd7   :  { %v437_v49 = vadd.f32 1e-05, %v413_v23  ;;  %v391_v11 = vsub.f32 %v343_v19, %v367_v43  ;;  %v250_v28 = vpop.xlane.xlu1 %249 }
  0xd8   :  { %1139 = vrsqrt.f32 %v438_v48  ;;  %v416_v25 = vmax.f32 %v392_v26, 0.0  ;;  %v346_v56 = vmul.f32 0.0051020407, %v250_v28  ;;  %v246_v31 = vpop.xlane.xlu0 %245  ;;  %v1687_v48 = vld [vmem:[%s2118_s1 + $0x18] sm:$0xff]  ;;  %v1701_v28 = vmul.f32 0.0051020407, %v1605_v37 }
  0xd9   :  { %1141 = vrsqrt.f32 %v437_v49  ;;  %v415_v34 = vmax.f32 %v391_v11, 0.0  ;;  %v345_v51 = vmul.f32 0.0051020407, %v246_v31  ;;  %v375_v11 = vmul.f32 %v1676_v20, %v1676_v20  ;;  %v1716_v37 = vld [vmem:[%s2118_s1 + $0x28] sm:$0xff] }
  0xda   :  { %v440_v54 = vadd.f32 1e-05, %v416_v25  ;;  %v394_v5 = vsub.f32 %v346_v56, %v370_v21  ;;  %v1696_v21 = vld [vmem:[%s2118_s1 + $0x10] sm:$0xff]  ;;  %v1708_v31 = vmul.f32 0.0051020407, %v1595_v61  ;;  %v1726_v61 = vld [vmem:[%s2118_s1 + $0x20] sm:$0xff] }
  0xdb   :  { %v439_v55 = vadd.f32 1e-05, %v415_v34  ;;  %v393_v58 = vsub.f32 %v345_v51, %v369_v30  ;;  %v258_v57 = vpop.xlane.xlu1 %257 }
  0xdc   :  { %1143 = vrsqrt.f32 %v440_v54  ;;  %v418_v62 = vmax.f32 %v394_v5, 0.0  ;;  %v254_v14 = vpop.xlane.xlu0 %253  ;;  %v348_v25 = vmul.f32 0.0051020407, %v258_v57 }
  0xdd   :  { %1145 = vrsqrt.f32 %v439_v55  ;;  %v417_v35 = vmax.f32 %v393_v58, 0.0  ;;  %v347_v59 = vmul.f32 0.0051020407, %v254_v14  ;;  %v372_v55 = vmul.f32 %v1690_v10, %v1690_v10 }
  0xde   :  { %v442_v8 = vadd.f32 1e-05, %v418_v62  ;;  %v1721_v58 = vmul.f32 0.0051020407, %v1599_v38  ;;  %v377_v14 = vmul.f32 %v1701_v28, %v1701_v28 }
  0xdf   :  { %v441_v15 = vadd.f32 1e-05, %v417_v35  ;;  %v395_v3 = vsub.f32 %v347_v59, %v371_v63  ;;  %v266_v16 = vpop.xlane.xlu1 %265  ;;  %v1731_v63 = vmul.f32 0.0051020407, %v1609_v41 }
  0xe0   :  { %1147 = vrsqrt.f32 %v442_v8  ;;  %v262_v17 = vpop.xlane.xlu0 %261  ;;  %v350_v35 = vmul.f32 0.0051020407, %v266_v16  ;;  %v396_v8 = vsub.f32 %v348_v25, %v372_v55  ;;  %v1744_v16 = vld [vmem:[%s2118_s1 + $0x38] sm:$0xff] }
  0xe1   :  { %v1136_v24 = vpop.eup %1135  ;;  %1149 = vrsqrt.f32 %v441_v15  ;;  %v419_v27 = vmax.f32 %v395_v3, 0.0  ;;  %v349_v32 = vmul.f32 0.0051020407, %v262_v17  ;;  %2121 = vst [vmem:[#allocation8_spill] sm:$0xff] %v1744_v16 }
  0xe2   :  { %v1138_v33 = vpop.eup %1137  ;;  %v1679_v13 = vmul.f32 %v1136_v24, %v1666_v18 }
  0xe3   :  { %v443_v40 = vadd.f32 1e-05, %v419_v27  ;;  %v397_v43 = vsub.f32 %v349_v32, %v373_v36  ;;  %v274_v23 = vpop.xlane.xlu1 %273  ;;  %v1682_v19 = vmul.f32 %v1138_v33, %v1673_v7  ;;  %v374_v36 = vmul.f32 %v1708_v31, %v1708_v31 }
  0xe4   :  { %v270_v26 = vpop.xlane.xlu0 %269  ;;  %682 = vperm.xlu1 %1132, %v1679_v13   ;;  %v376_v27 = vmul.f32 %v1721_v58, %v1721_v58  ;;  %v1749_v32 = vmul.f32 0.0051020407, %v1613_v44  ;;  %v1760_v44 = vmul.f32 0.0051020407, %v1603_v39  ;;  %v1774_v39 = vld [vmem:[%s2118_s1 + $0x40] sm:$0xff] }
  0xe5   :  { %v1140_v49 = vpop.eup %1139  ;;  %1151 = vrsqrt.f32 %v443_v40  ;;  %v351_v30 = vmul.f32 0.0051020407, %v270_v26  ;;  %677 = vperm.xlu0 %1131, %v1682_v19   ;;  %v421_v34 = vmax.f32 %v397_v43, 0.0  ;;  %v1754_v40 = vld [vmem:[%s2118_s1 + $0x30] sm:$0xff]  ;;  %v379_v26 = vmul.f32 %v1731_v63, %v1731_v63 }
  0xe6   :  { %v1142_v4 = vpop.eup %1141  ;;  %v1705_v56 = vmul.f32 %v1140_v49, %v1687_v48  ;;  %v398_v49 = vsub.f32 %v350_v35, %v374_v36  ;;  %v1769_v35 = vmul.f32 0.0051020407, %v1617_v6  ;;  %v531_v6 = vmul.f32 %v1682_v19, %v1625_v1 }
  0xe7   :  { %v399_v51 = vsub.f32 %v351_v30, %v375_v11  ;;  %v282_v54 = vpop.xlane.xlu1 %281  ;;  %v1711_v5 = vmul.f32 %v1142_v4, %v1696_v21  ;;  %v445_v17 = vadd.f32 1e-05, %v421_v34  ;;  %v352_v11 = vmul.f32 0.0051020407, %v274_v23 }
  0xe8   :  { %v278_v57 = vpop.xlane.xlu0 %277  ;;  %v420_v34 = vmax.f32 %v396_v8, 0.0  ;;  %v381_v23 = vmul.f32 %v1749_v32, %v1749_v32 }
  0xe9   :  { %v1144_v62 = vpop.eup %1143  ;;  %v353_v59 = vmul.f32 0.0051020407, %v278_v57  ;;  %692 = vperm.xlu0 %1131, %v1705_v56   ;;  %687 = vperm.xlu1 %1132, %v1711_v5   ;;  %v423_v15 = vmax.f32 %v399_v51, 0.0  ;;  %1153 = vrsqrt.f32 %v445_v17  ;;  %v400_v8 = vsub.f32 %v352_v11, %v376_v27 }
  0xea   :  { %v1146_v38 = vpop.eup %1145  ;;  %v1736_v3 = vmul.f32 %v1144_v62, %v1716_v37  ;;  %v1788_v11 = vmul.f32 0.0051020407, %v1623_v50 }
  0xeb   :  { %v401_v24 = vsub.f32 %v353_v59, %v377_v14  ;;  %v511_v41 = vmul.f32 %v1146_v38, %v1726_v61  ;;  %v290_v30 = vpop.xlane.xlu1 %289  ;;  %v447_v51 = vadd.f32 1e-05, %v423_v15  ;;  %v422_v38 = vmax.f32 %v398_v49, 0.0 }
  0xec   :  { %v286_v33 = vpop.xlane.xlu0 %285  ;;  %v354_v15 = vmul.f32 0.0051020407, %v282_v54  ;;  %v1783_v54 = vmul.f32 0.0051020407, %v1607_v42  ;;  %v383_v49 = vmul.f32 %v1769_v35, %v1769_v35  ;;  %v356_v19 = vmul.f32 0.0051020407, %v290_v30 }
  0xed   :  { %v1148_v43 = vpop.eup %1147  ;;  %v355_v4 = vmul.f32 0.0051020407, %v286_v33  ;;  %702 = vperm.xlu0 %1131, %v1736_v3   ;;  %697 = vperm.xlu1 %1132, %v511_v41   ;;  %v425_v57 = vmax.f32 %v401_v24, 0.0  ;;  %v378_v24 = vmul.f32 %v1760_v44, %v1760_v44  ;;  %v444_v33 = vadd.f32 1e-05, %v420_v34 }
  0xee   :  { %v1150_v25 = vpop.eup %1149  ;;  %v1763_v55 = vmul.f32 %v1148_v43, %v1744_v16  ;;  %1155 = vrsqrt.f32 %v447_v51  ;;  %v446_v51 = vadd.f32 1e-05, %v422_v38  ;;  %v535_v42 = vmul.f32 %v511_v41, %v1641_v12 }
  0xef   :  { %v403_v62 = vsub.f32 %v355_v4, %v379_v26  ;;  %v513_v14 = vmul.f32 %v1150_v25, %v1754_v40  ;;  %v449_v43 = vadd.f32 1e-05, %v425_v57  ;;  %v298_v4 = vpop.xlane.xlu1 %297  ;;  %v402_v16 = vsub.f32 %v354_v15, %v378_v24 }
  0xf0   :  { %v294_v59 = vpop.xlane.xlu0 %293  ;;  %1157 = vrsqrt.f32 %v444_v33  ;;  %v532_v57 = vmul.f32 %v1679_v13, %v1621_v45  ;;  %v380_v38 = vmul.f32 %v1783_v54, %v1783_v54  ;;  %v385_v15 = vmul.f32 %v1788_v11, %v1788_v11 }
  0xf1   :  { %v357_v36 = vmul.f32 0.0051020407, %v294_v59  ;;  %712 = vperm.xlu0 %1131, %v1763_v55   ;;  %707 = vperm.xlu1 %1132, %v513_v14   ;;  %v427_v26 = vmax.f32 %v403_v62, 0.0  ;;  %v424_v59 = vmax.f32 %v400_v8, 0.0  ;;  %1159 = vrsqrt.f32 %v449_v43 }
  0xf2   :  { %v1152_v17 = vpop.eup %1151  ;;  %v1797_v8 = vmul.f32 0.0051020407, %v1611_v2  ;;  %1161 = vrsqrt.f32 %v446_v51  ;;  %v426_v12 = vmax.f32 %v402_v16, 0.0  ;;  %v404_v45 = vsub.f32 %v356_v19, %v380_v38 }
  0xf3   :  { %v405_v25 = vsub.f32 %v357_v36, %v381_v23  ;;  %v515_v27 = vmul.f32 %v1152_v17, %v1774_v39  ;;  %v451_v62 = vadd.f32 1e-05, %v427_v26  ;;  %v448_v30 = vadd.f32 1e-05, %v424_v59  ;;  %v306_v41 = vpop.xlane.xlu1 %305 }
  0xf4   :  { %v302_v34 = vpop.xlane.xlu0 %301  ;;  %v358_v13 = vmul.f32 0.0051020407, %v298_v4  ;;  %v537_v24 = vmul.f32 %v513_v14, %v1647_v22  ;;  %v533_v2 = vmul.f32 %v1711_v5, %v1631_v53  ;;  %v382_v16 = vmul.f32 %v1797_v8, %v1797_v8  ;;  %v1814_v4 = vld [vmem:[%s2118_s1 + $0x50] sm:$0xff] }
  0xf5   :  { %v359_v1 = vmul.f32 0.0051020407, %v302_v34  ;;  %579 = vrot.lane.b32.xlu0 %v531_v6, %s1279_s5  ;;  %717 = vperm.xlu1 %1132, %v515_v27   ;;  %v429_v50 = vmax.f32 %v405_v25, 0.0  ;;  %1163 = vrsqrt.f32 %v451_v62  ;;  %v1809_v25 = vmul.f32 0.0051020407, %v1615_v46 }
  0xf6   :  { %v1154_v26 = vpop.eup %1153  ;;  %1165 = vrsqrt.f32 %v448_v30  ;;  %v450_v22 = vadd.f32 1e-05, %v426_v12  ;;  %v534_v53 = vmul.f32 %v1705_v56, %v1627_v52  ;;  %v428_v5 = vmax.f32 %v404_v45, 0.0  ;;  %v1829_v52 = vld [vmem:[%s2118_s1 + $0x60] sm:$0xff] }
  0xf7   :  { %v407_v23 = vsub.f32 %v359_v1, %v383_v49  ;;  %v453_v33 = vadd.f32 1e-05, %v429_v50  ;;  %v406_v14 = vsub.f32 %v358_v13, %v382_v16  ;;  %v360_v49 = vmul.f32 0.0051020407, %v306_v41  ;;  %v314_v59 = vpop.xlane.xlu1 %313 }
  0xf8   :  { %v310_v36 = vpop.xlane.xlu0 %309  ;;  %v539_v46 = vmul.f32 %v515_v27, %v1656_v29  ;;  %v1822_v19 = vmul.f32 %v1154_v26, %v1814_v4  ;;  %v1832_v56 = vmul.f32 0.0051020407, %v1619_v47  ;;  %v536_v29 = vmul.f32 %v1736_v3, %v1635_v60  ;;  %v1851_v60 = vld [vmem:[%s2118_s1 + $0x70] sm:$0xff] }
  0xf9   :  { %v361_v17 = vmul.f32 0.0051020407, %v310_v36  ;;  %587 = vrot.lane.b32.xlu0 %v535_v42, %s1279_s5  ;;  %581 = vrot.lane.b32.xlu1 %v532_v57, %s1279_s5  ;;  %v431_v6 = vmax.f32 %v407_v23, 0.0  ;;  %1167 = vrsqrt.f32 %v453_v33  ;;  %v384_v42 = vmul.f32 %v1809_v25, %v1809_v25  ;;  %v1846_v36 = vld [vmem:[%s2118_s1 + $0x48] sm:$0xff]  ;;  %v1870_v33 = vld [vmem:[%s2118_s1 + $0x58] sm:$0xff] }
  0xfa   :  { %1169 = vrsqrt.f32 %v450_v22  ;;  %v452_v27 = vadd.f32 1e-05, %v428_v5  ;;  %v430_v57 = vmax.f32 %v406_v14, 0.0  ;;  %v362_v50 = vmul.f32 0.0051020407, %v314_v59  ;;  %v1888_v5 = vld [vmem:[%s2118_s1 + $0x68] sm:$0xff] }
  0xfb   :  { %v409_v43 = vsub.f32 %v361_v17, %v385_v15  ;;  %v1156_v34 = vpop.eup %1155  ;;  %v455_v51 = vadd.f32 1e-05, %v431_v6  ;;  %v408_v62 = vsub.f32 %v360_v49, %v384_v42  ;;  %v541_v15 = vmul.f32 %v1822_v19, %v1659_v0  ;;  %v1893_v49 = vld [vmem:[%s2118_s1 + $0x90] sm:$0xff]  ;;  %v1904_v42 = vld [vmem:[%s2118_s1 + $0x78] sm:$0xff] }
  0xfc   :  { %v1841_v47 = vmul.f32 %v1156_v34, %v1829_v52  ;;  %v386_v3 = vmul.f32 %v1832_v56, %v1832_v56  ;;  %v538_v0 = vmul.f32 %v1763_v55, %v1645_v9  ;;  %v454_v41 = vadd.f32 1e-05, %v430_v57  ;;  %v1875_v55 = vld [vmem:[%s2118_s1 + $0x80] sm:$0xff] }
  0xfd   :  { %591 = vrot.lane.b32.xlu0 %v537_v24, %s1279_s5  ;;  %583 = vrot.lane.b32.xlu1 %v533_v2, %s1279_s5  ;;  %v433_v1 = vmax.f32 %v409_v43, 0.0  ;;  %v1158_v23 = vpop.eup %1157  ;;  %1171 = vrsqrt.f32 %v455_v51  ;;  %v432_v17 = vmax.f32 %v408_v62, 0.0 }
  0xfe   :  { %v1160_v30 = vpop.eup %1159  ;;  %1173 = vrsqrt.f32 %v452_v27  ;;  %v1860_v45 = vmul.f32 %v1158_v23, %v1846_v36  ;;  %v410_v13 = vsub.f32 %v362_v50, %v386_v3  ;;  %v543_v24 = vmul.f32 %v1841_v47, %v1676_v20  ;;  %v1920_v23 = vld [vmem:[%s2118_s1 + $0x88] sm:$0xff] }
  0xff   :  { %v457_v38 = vadd.f32 1e-05, %v433_v1  ;;  %v1162_v12 = vpop.eup %1161  ;;  %v1865_v2 = vmul.f32 %v1160_v30, %v1851_v60  ;;  %v456_v26 = vadd.f32 1e-05, %v432_v17  ;;  %v1946_v17 = vld [vmem:[%s2118_s1 + $0xa8] sm:$0xff] }
 0x100   :  { %v540_v20 = vmul.f32 %v1860_v45, %v1690_v10  ;;  %v518_v43 = vmul.f32 %v1162_v12, %v1870_v33  ;;  %v434_v16 = vmax.f32 %v410_v13, 0.0 }
 0x101   :  { %585 = vrot.lane.b32.xlu1 %v534_v53, %s1279_s5  ;;  %595 = vrot.lane.b32.xlu0 %v539_v46, %s1279_s5  ;;  %1175 = vrsqrt.f32 %v457_v38  ;;  %v545_v22 = vmul.f32 %v1865_v2, %v1701_v28  ;;  %v1925_v38 = vld [vmem:[%s2118_s1 + $0xb0] sm:$0xff] }
 0x102   :  { %v1164_v9 = vpop.eup %1163  ;;  %1177 = vrsqrt.f32 %v454_v41  ;;  %v542_v28 = vmul.f32 %v518_v43, %v1708_v31  ;;  %v458_v34 = vadd.f32 1e-05, %v434_v16 }
 0x103   :  { %v1166_v6 = vpop.eup %1165  ;;  %v523_v53 = vmul.f32 %v1164_v9, %v1875_v55  ;;  %1179 = vrsqrt.f32 %v456_v26 }
 0x104   :  { %v520_v46 = vmul.f32 %v1166_v6, %v1888_v5  ;;  %1181 = vrsqrt.f32 %v458_v34 }
 0x105   :  { %589 = vrot.lane.b32.xlu1 %v536_v29, %s1279_s5  ;;  %599 = vrot.lane.b32.xlu0 %v541_v15, %s1279_s5  ;;  %v547_v51 = vmul.f32 %v523_v53, %v1731_v63  ;;  %v1909_v29 = vld [vmem:[%s2118_s1 + $0xa0] sm:$0xff] }
 0x106   :  { %v1168_v14 = vpop.eup %1167  ;;  %v544_v31 = vmul.f32 %v520_v46, %v1721_v58 }
 0x107   :  { %v1170_v10 = vpop.eup %1169  ;;  %v525_v59 = vmul.f32 %v1168_v14, %v1893_v49 }
 0x108   :  { %v522_v57 = vmul.f32 %v1170_v10, %v1904_v42 }
 0x109   :  { %593 = vrot.lane.b32.xlu1 %v538_v0, %s1279_s5  ;;  %603 = vrot.lane.b32.xlu0 %v543_v24, %s1279_s5  ;;  %v549_v27 = vmul.f32 %v525_v59, %v1749_v32  ;;  %v1936_v0 = vld [vmem:[%s2118_s1 + $0x98] sm:$0xff] }
 0x10a   :  { %v1172_v1 = vpop.eup %1171  ;;  %v546_v32 = vmul.f32 %v522_v57, %v1760_v44 }
 0x10b   :  { %v1174_v63 = vpop.eup %1173  ;;  %v527_v62 = vmul.f32 %v1172_v1, %v1909_v29 }
 0x10c   :  { %v524_v30 = vmul.f32 %v1174_v63, %v1920_v23 }
 0x10d   :  { %597 = vrot.lane.b32.xlu1 %v540_v20, %s1279_s5  ;;  %607 = vrot.lane.b32.xlu0 %v545_v22, %s1279_s5  ;;  %v551_v15 = vmul.f32 %v527_v62, %v1769_v35 }
 0x10e   :  { %v1176_v50 = vpop.eup %1175  ;;  %v548_v12 = vmul.f32 %v524_v30, %v1783_v54  ;;  %v1955_v54 = vld [vmem:[%s2118_s1 + $0xb8] sm:$0xff]  ;;  %s1281_s1 = smov [#allocation5]  }
 0x10f   :  { %v1178_v58 = vpop.eup %1177  ;;  %v529_v3 = vmul.f32 %v1176_v50, %v1925_v38 }
 0x110   :  { %v526_v44 = vmul.f32 %v1178_v58, %v1936_v0  ;;  %v1180_v35 = vpop.eup %1179  ;;  %v2122_v58 = vld [vmem:[#allocation8_spill] sm:$0xff] }
 0x111   :  { %601 = vrot.lane.b32.xlu1 %v542_v28, %s1279_s5  ;;  %611 = vrot.lane.b32.xlu0 %v547_v51, %s1279_s5  ;;  %v553_v41 = vmul.f32 %v529_v3, %v1788_v11  ;;  %v528_v24 = vmul.f32 %v1180_v35, %v1946_v17  ;;  %v1182_v9 = vpop.eup %1181 }
 0x112   :  { %v550_v13 = vmul.f32 %v526_v44, %v1797_v8  ;;  %v530_v6 = vmul.f32 %v1182_v9, %v1955_v54 }
 0x113   :  { %v552_v11 = vmul.f32 %v528_v24, %v1809_v25  ;;  %v1280_v25 = vmov 1  }
 0x114   :  { %v554_v8 = vmul.f32 %v530_v6, %v1832_v56 }
 0x115   :  { %605 = vrot.lane.b32.xlu1 %v544_v31, %s1279_s5  ;;  %615 = vrot.lane.b32.xlu0 %v549_v27, %s1279_s5 }
 0x119   :  { %609 = vrot.lane.b32.xlu1 %v546_v32, %s1279_s5  ;;  %619 = vrot.lane.b32.xlu0 %v551_v15, %s1279_s5 }
 0x11d   :  { %613 = vrot.lane.b32.xlu1 %v548_v12, %s1279_s5  ;;  %623 = vrot.lane.b32.xlu0 %v553_v41, %s1279_s5 }
 0x121   :  { %617 = vrot.lane.b32.xlu1 %v550_v13, %s1279_s5  ;;  %722 = vperm.xlu0 %1131, %v1860_v45  }
 0x125   :  { %621 = vrot.lane.b32.xlu1 %v552_v11, %s1279_s5  ;;  %732 = vperm.xlu0 %1131, %v518_v43  }
 0x129   :  { %625 = vrot.lane.b32.xlu1 %v554_v8, %s1279_s5  ;;  %742 = vperm.xlu0 %1131, %v520_v46   ;;  %s1112_s5 = sshll.u32 %s1281_s1, 4  ;;  %s1113_s5 = int_to_ptr.vmem [resolvable:$true] %s1112_s5 }
 0x12a   :  { %s1251_s10 = scalar_lea.vmem %s1113_s5, 6144  ;;  %p1256_p6 = scmp.lt.s32.totalorder %s1113_s5, %s1113_s5 }
 0x12b   :  { %p1252_p5 = scmp.ne.s32.totalorder %s1113_s5, %s1251_s10  ;;  %p1257_p7 = scmp.lt.s32.totalorder %s1251_s10, %s1251_s10 }
 0x12d   :  { %727 = vperm.xlu1 %1132, %v1822_v19   ;;  %752 = vperm.xlu0 %1131, %v522_v57   ;;  %p1258_p8 = por %p1257_p7, %p1256_p6 }
 0x12f   :  { %p1259_p9 = pnand %p1258_p8, %p1252_p5 }
 0x131   :  { %737 = vperm.xlu1 %1132, %v1841_v47   ;;  %762 = vperm.xlu0 %1131, %v524_v30  }
 0x135   :  { %747 = vperm.xlu1 %1132, %v1865_v2   ;;  %772 = vperm.xlu0 %1131, %v526_v44  }
 0x139   :  { %757 = vperm.xlu1 %1132, %v523_v53   ;;  %782 = vperm.xlu0 %1131, %v528_v24  }
 0x13d   :  { %767 = vperm.xlu1 %1132, %v525_v59   ;;  %792 = vperm.xlu0 %1131, %v530_v6  }
 0x141   :  { %777 = vperm.xlu1 %1132, %v527_v62   ;;  %1134 = vset.pattern.permute.xlu0 %v1280_v25 }
 0x145   :  { %787 = vperm.xlu1 %1132, %v529_v3  }
 0x149   :  { %1133 = vset.pattern.permute.xlu1 %v1280_v25 }
 0x15f   :  { %v1967_v56 = vpop.permute.xlu1 %682 }
 0x160   :  { %v1969_v45 = vpop.permute.xlu0 %677 }
 0x164   :  { %v1971_v19 = vpop.permute.xlu1 %687  ;;  %v1973_v47 = vpop.permute.xlu0 %692 }
 0x168   :  { %v1975_v20 = vpop.permute.xlu1 %697  ;;  %v1977_v2 = vpop.permute.xlu0 %702 }
 0x16c   :  { %v1979_v43 = vpop.permute.xlu1 %707  ;;  %v1981_v26 = vpop.permute.xlu0 %712 }
 0x170   :  { %v1983_v16 = vpop.permute.xlu1 %717  ;;  %v580_v22 = vpop.permute.xlu0 %579 }
 0x171   :  { %v651_v53 = vsub.f32 %v1673_v7, %v580_v22 }
 0x173   :  { %845 = vperm.xlu1 %1133, %v651_v53  }
 0x174   :  { %v582_v14 = vpop.permute.xlu1 %581  ;;  %v588_v10 = vpop.permute.xlu0 %587 }
 0x175   :  { %v652_v28 = vsub.f32 %v1666_v18, %v582_v14  ;;  %v655_v51 = vsub.f32 %v1726_v61, %v588_v10 }
 0x177   :  { %850 = vperm.xlu0 %1134, %v652_v28  }
 0x178   :  { %v584_v46 = vpop.permute.xlu1 %583  ;;  %v592_v34 = vpop.permute.xlu0 %591 }
 0x179   :  { %v653_v59 = vsub.f32 %v1696_v21, %v584_v46  ;;  %v657_v63 = vsub.f32 %v1754_v40, %v592_v34 }
 0x17b   :  { %855 = vperm.xlu1 %1133, %v653_v59   ;;  %865 = vperm.xlu0 %1134, %v655_v51   ;;  %v1183_v59 = vld [vmem:[#allocation2] sm:$0xff] }
 0x17c   :  { %v586_v1 = vpop.permute.xlu1 %585  ;;  %v596_v31 = vpop.permute.xlu0 %595 }
 0x17d   :  { %v654_v7 = vsub.f32 %v1687_v48, %v586_v1  ;;  %v659_v18 = vsub.f32 %v1774_v39, %v596_v31  ;;  %v795_v1 = vmul.f32 %v1183_v59, %v1969_v45  ;;  %v1184_v31 = vld [vmem:[#allocation2 + $0x8] sm:$0xff] }
 0x17f   :  { %860 = vperm.xlu1 %1133, %v654_v7   ;;  %875 = vperm.xlu0 %1134, %v657_v63   ;;  %v796_v63 = vmul.f32 %v1184_v31, %v1969_v45  ;;  %v1187_v45 = vld [vmem:[#allocation2 + $0x20] sm:$0xff] }
 0x180   :  { %v590_v27 = vpop.permute.xlu1 %589  ;;  %v600_v57 = vpop.permute.xlu0 %599 }
 0x181   :  { %v656_v62 = vsub.f32 %v1716_v37, %v590_v27  ;;  %v661_v50 = vsub.f32 %v1814_v4, %v600_v57 }
 0x183   :  { %870 = vperm.xlu1 %1133, %v656_v62   ;;  %885 = vperm.xlu0 %1134, %v659_v18   ;;  %v1185_v62 = vld [vmem:[#allocation2 + $0x10] sm:$0xff] }
 0x184   :  { %v594_v61 = vpop.permute.xlu1 %593  ;;  %v604_v21 = vpop.permute.xlu0 %603 }
 0x185   :  { %v658_v32 = vsub.f32 %v2122_v58, %v594_v61  ;;  %v663_v15 = vsub.f32 %v1829_v52, %v604_v21  ;;  %v797_v61 = vmul.f32 %v1185_v62, %v1967_v56  ;;  %v1186_v21 = vld [vmem:[#allocation2 + $0x18] sm:$0xff] }
 0x187   :  { %880 = vperm.xlu1 %1133, %v658_v32   ;;  %895 = vperm.xlu0 %1134, %v661_v50   ;;  %v798_v50 = vmul.f32 %v1186_v21, %v1967_v56 }
 0x188   :  { %v598_v40 = vpop.permute.xlu1 %597  ;;  %v608_v48 = vpop.permute.xlu0 %607 }
 0x189   :  { %v660_v30 = vsub.f32 %v1846_v36, %v598_v40  ;;  %v665_v3 = vsub.f32 %v1851_v60, %v608_v48 }
 0x18b   :  { %890 = vperm.xlu1 %1133, %v660_v30   ;;  %905 = vperm.xlu0 %1134, %v663_v15   ;;  %v799_v30 = vmul.f32 %v1187_v45, %v1971_v19 }
 0x18c   :  { %v602_v39 = vpop.permute.xlu1 %601  ;;  %v612_v37 = vpop.permute.xlu0 %611 }
 0x18d   :  { %v662_v12 = vsub.f32 %v1870_v33, %v602_v39  ;;  %v667_v44 = vsub.f32 %v1875_v55, %v612_v37  ;;  %v1188_v39 = vld [vmem:[#allocation2 + $0x28] sm:$0xff] }
 0x18e   :  { %v800_v37 = vmul.f32 %v1188_v39, %v1971_v19 }
 0x18f   :  { %900 = vperm.xlu1 %1133, %v662_v12   ;;  %915 = vperm.xlu0 %1134, %v665_v3   ;;  %v1189_v3 = vld [vmem:[#allocation2 + $0x40] sm:$0xff] }
 0x190   :  { %v606_v4 = vpop.permute.xlu1 %605  ;;  %v616_v41 = vpop.permute.xlu0 %615  ;;  %v803_v12 = vmul.f32 %v1189_v3, %v1975_v20 }
 0x191   :  { %v664_v35 = vsub.f32 %v1888_v5, %v606_v4  ;;  %v669_v13 = vsub.f32 %v1893_v49, %v616_v41  ;;  %v1190_v4 = vld [vmem:[#allocation2 + $0x48] sm:$0xff] }
 0x192   :  { %v804_v56 = vmul.f32 %v1190_v4, %v1975_v20 }
 0x193   :  { %910 = vperm.xlu1 %1133, %v664_v35   ;;  %925 = vperm.xlu0 %1134, %v667_v44  }
 0x194   :  { %v610_v52 = vpop.permute.xlu1 %609  ;;  %v620_v36 = vpop.permute.xlu0 %619 }
 0x195   :  { %v666_v24 = vsub.f32 %v1904_v42, %v610_v52  ;;  %v671_v33 = vsub.f32 %v1909_v29, %v620_v36 }
 0x197   :  { %920 = vperm.xlu1 %1133, %v666_v24   ;;  %935 = vperm.xlu0 %1134, %v669_v13  }
 0x198   :  { %v614_v60 = vpop.permute.xlu1 %613  ;;  %v624_v11 = vpop.permute.xlu0 %623 }
 0x199   :  { %v668_v9 = vsub.f32 %v1920_v23, %v614_v60  ;;  %v673_v5 = vsub.f32 %v1925_v38, %v624_v11 }
 0x19b   :  { %930 = vperm.xlu1 %1133, %v668_v9   ;;  %945 = vperm.xlu0 %1134, %v671_v33   ;;  %v1191_v33 = vld [vmem:[#allocation2 + $0x30] sm:$0xff]  ;;  %v1192_v9 = vld [vmem:[#allocation2 + $0x38] sm:$0xff] }
 0x19c   :  { %v618_v55 = vpop.permute.xlu1 %617  ;;  %v2009_v29 = vpop.permute.xlu0 %722  ;;  %v801_v19 = vmul.f32 %v1191_v33, %v1973_v47  ;;  %v802_v11 = vmul.f32 %v1192_v9, %v1973_v47 }
 0x19d   :  { %v670_v6 = vsub.f32 %v1936_v0, %v618_v55  ;;  %v1193_v55 = vld [vmem:[#allocation2 + $0x60] sm:$0xff] }
 0x19e   :  { %v807_v20 = vmul.f32 %v1193_v55, %v1979_v43 }
 0x19f   :  { %940 = vperm.xlu1 %1133, %v670_v6   ;;  %955 = vperm.xlu0 %1134, %v673_v5   ;;  %v1194_v5 = vld [vmem:[#allocation2 + $0x68] sm:$0xff] }
 0x1a0   :  { %v622_v49 = vpop.permute.xlu1 %621  ;;  %v2013_v22 = vpop.permute.xlu0 %732  ;;  %v808_v6 = vmul.f32 %v1194_v5, %v1979_v43  ;;  %v1196_v43 = vld [vmem:[#allocation2 + $0x58] sm:$0xff] }
 0x1a1   :  { %v672_v42 = vsub.f32 %v1946_v17, %v622_v49  ;;  %v806_v62 = vmul.f32 %v1196_v43, %v1977_v2 }
 0x1a3   :  { %950 = vperm.xlu1 %1133, %v672_v42  }
 0x1a4   :  { %v626_v8 = vpop.permute.xlu1 %625  ;;  %v2017_v38 = vpop.permute.xlu0 %742 }
 0x1a5   :  { %v674_v25 = vsub.f32 %v1955_v54, %v626_v8 }
 0x1a7   :  { %960 = vperm.xlu1 %1133, %v674_v25  }
 0x1a8   :  { %v2011_v23 = vpop.permute.xlu1 %727  ;;  %v2021_v14 = vpop.permute.xlu0 %752 }
 0x1ac   :  { %v2015_v53 = vpop.permute.xlu1 %737  ;;  %v2025_v10 = vpop.permute.xlu0 %762 }
 0x1b0   :  { %v2019_v0 = vpop.permute.xlu1 %747  ;;  %v2029_v28 = vpop.permute.xlu0 %772 }
 0x1b4   :  { %v2023_v17 = vpop.permute.xlu1 %757  ;;  %v2033_v34 = vpop.permute.xlu0 %782 }
 0x1b8   :  { %v2027_v54 = vpop.permute.xlu1 %767  ;;  %v2039_v7 = vpop.permute.xlu0 %792 }
 0x1bc   :  { %v2031_v46 = vpop.permute.xlu1 %777 }
 0x1c0   :  { %v2035_v51 = vpop.permute.xlu1 %787 }
 0x1ee   :  { %v846_v27 = vpop.permute.xlu1 %845 }
 0x1ef   :  { %v963_v57 = vadd.f32 %v846_v27, %v795_v1  ;;  %v964_v18 = vadd.f32 %v846_v27, %v796_v63 }
 0x1f1   :  { %v1011_v58 = vmax.f32 %v963_v57, 0.0  ;;  %v1012_v32 = vmax.f32 %v964_v18, 0.0  ;;  %v1195_v57 = vld [vmem:[#allocation2 + $0x50] sm:$0xff] }
 0x1f2   :  { %v851_v40 = vpop.permute.xlu0 %850  ;;  %v805_v18 = vmul.f32 %v1195_v57, %v1977_v2 }
 0x1f3   :  { %1059 = vst [vmem:[#allocation5] sm:$0xff] %v1011_v58  ;;  %1060 = vst.msk [vmem:[#allocation5 + $0x8] sm:$0xff] %vm74_vm0, %v1012_v32  ;;  %v965_v48 = vadd.f32 %v851_v40, %v797_v61  ;;  %v966_v15 = vadd.f32 %v851_v40, %v798_v50  ;;  %v1197_v61 = vld [vmem:[#allocation2 + $0x80] sm:$0xff]  ;;  %v1198_v50 = vld [vmem:[#allocation2 + $0x88] sm:$0xff] }
 0x1f4   :  { %v811_v21 = vmul.f32 %v1197_v61, %v1983_v16  ;;  %v812_v58 = vmul.f32 %v1198_v50, %v1983_v16  ;;  %v1200_v16 = vld [vmem:[#allocation2 + $0x78] sm:$0xff]  ;;  %v1209_v50 = vld [vmem:[#allocation2 + $0xe0] sm:$0xff] }
 0x1f5   :  { %v1013_v41 = vmax.f32 %v965_v48, 0.0  ;;  %v1014_v44 = vmax.f32 %v966_v15, 0.0 }
 0x1f6   :  { %v856_v35 = vpop.permute.xlu1 %855  ;;  %v866_v52 = vpop.permute.xlu0 %865 }
 0x1f7   :  { %1061 = vst [vmem:[#allocation5 + $0x10] sm:$0xff] %v1013_v41  ;;  %1062 = vst.msk [vmem:[#allocation5 + $0x18] sm:$0xff] %vm74_vm0, %v1014_v44  ;;  %v967_v36 = vadd.f32 %v856_v35, %v799_v30  ;;  %v968_v13 = vadd.f32 %v856_v35, %v800_v37  ;;  %v971_v24 = vadd.f32 %v866_v52, %v803_v12  ;;  %v1199_v12 = vld [vmem:[#allocation2 + $0x70] sm:$0xff]  ;;  %v1201_v41 = vld [vmem:[#allocation2 + $0xa0] sm:$0xff] }
 0x1f8   :  { %v972_v60 = vadd.f32 %v866_v52, %v804_v56  ;;  %v809_v4 = vmul.f32 %v1199_v12, %v1981_v26  ;;  %v810_v56 = vmul.f32 %v1200_v16, %v1981_v26  ;;  %v815_v44 = vmul.f32 %v1201_v41, %v2011_v23  ;;  %v1202_v35 = vld [vmem:[#allocation2 + $0xa8] sm:$0xff]  ;;  %v1213_v41 = vld [vmem:[#allocation2 + $0x100] sm:$0xff] }
 0x1f9   :  { %v1015_v49 = vmax.f32 %v967_v36, 0.0  ;;  %v1016_v42 = vmax.f32 %v968_v13, 0.0  ;;  %v1019_v8 = vmax.f32 %v971_v24, 0.0  ;;  %v816_v52 = vmul.f32 %v1202_v35, %v2011_v23  ;;  %v1204_v23 = vld [vmem:[#allocation2 + $0x98] sm:$0xff]  ;;  %v1214_v35 = vld [vmem:[#allocation2 + $0x108] sm:$0xff] }
 0x1fa   :  { %v1020_v25 = vmax.f32 %v972_v60, 0.0  ;;  %v861_v59 = vpop.permute.xlu1 %860  ;;  %v876_v1 = vpop.permute.xlu0 %875 }
 0x1fb   :  { %1063 = vst [vmem:[#allocation5 + $0x20] sm:$0xff] %v1015_v49  ;;  %1064 = vst.msk [vmem:[#allocation5 + $0x28] sm:$0xff] %vm74_vm0, %v1016_v42  ;;  %v969_v31 = vadd.f32 %v861_v59, %v801_v19  ;;  %v970_v47 = vadd.f32 %v861_v59, %v802_v11  ;;  %v975_v63 = vadd.f32 %v876_v1, %v807_v20  ;;  %v1203_v20 = vld [vmem:[#allocation2 + $0x90] sm:$0xff]  ;;  %v1205_v49 = vld [vmem:[#allocation2 + $0xc0] sm:$0xff] }
 0x1fc   :  { %1067 = vst [vmem:[#allocation5 + $0x40] sm:$0xff] %v1019_v8  ;;  %1068 = vst.msk [vmem:[#allocation5 + $0x48] sm:$0xff] %vm74_vm0, %v1020_v25  ;;  %v976_v27 = vadd.f32 %v876_v1, %v808_v6  ;;  %v813_v5 = vmul.f32 %v1203_v20, %v2009_v29  ;;  %v814_v6 = vmul.f32 %v1204_v23, %v2009_v29  ;;  %v1206_v8 = vld [vmem:[#allocation2 + $0xc8] sm:$0xff]  ;;  %v1217_v23 = vld [vmem:[#allocation2 + $0x120] sm:$0xff] }
 0x1fd   :  { %v1017_v32 = vmax.f32 %v969_v31, 0.0  ;;  %v1018_v40 = vmax.f32 %v970_v47, 0.0  ;;  %v1023_v48 = vmax.f32 %v975_v63, 0.0  ;;  %v819_v42 = vmul.f32 %v1205_v49, %v2015_v53  ;;  %v1218_v49 = vld [vmem:[#allocation2 + $0x128] sm:$0xff] }
 0x1fe   :  { %v1024_v15 = vmax.f32 %v976_v27, 0.0  ;;  %v871_v45 = vpop.permute.xlu1 %870  ;;  %v886_v30 = vpop.permute.xlu0 %885  ;;  %v820_v25 = vmul.f32 %v1206_v8, %v2015_v53  ;;  %v1208_v53 = vld [vmem:[#allocation2 + $0xb8] sm:$0xff] }
 0x1ff   :  { %1065 = vst [vmem:[#allocation5 + $0x30] sm:$0xff] %v1017_v32  ;;  %1066 = vst.msk [vmem:[#allocation5 + $0x38] sm:$0xff] %vm74_vm0, %v1018_v40  ;;  %v973_v39 = vadd.f32 %v871_v45, %v805_v18  ;;  %v974_v2 = vadd.f32 %v871_v45, %v806_v62  ;;  %v979_v37 = vadd.f32 %v886_v30, %v811_v21  ;;  %v1207_v62 = vld [vmem:[#allocation2 + $0xb0] sm:$0xff]  ;;  %v1210_v32 = vld [vmem:[#allocation2 + $0xe8] sm:$0xff] }
 0x200   :  { %1071 = vst [vmem:[#allocation5 + $0x60] sm:$0xff] %v1023_v48  ;;  %1072 = vst.msk [vmem:[#allocation5 + $0x68] sm:$0xff] %vm74_vm0, %v1024_v15  ;;  %v980_v3 = vadd.f32 %v886_v30, %v812_v58  ;;  %v817_v61 = vmul.f32 %v1207_v62, %v2013_v22  ;;  %v818_v21 = vmul.f32 %v1208_v53, %v2013_v22  ;;  %v1221_v62 = vld [vmem:[#allocation2 + $0x140] sm:$0xff]  ;;  %v1222_v53 = vld [vmem:[#allocation2 + $0x148] sm:$0xff] }
 0x201   :  { %v1021_v36 = vmax.f32 %v973_v39, 0.0  ;;  %v1022_v13 = vmax.f32 %v974_v2, 0.0  ;;  %v1027_v24 = vmax.f32 %v979_v37, 0.0  ;;  %v823_v58 = vmul.f32 %v1209_v50, %v2019_v0 }
 0x202   :  { %v1028_v60 = vmax.f32 %v980_v3, 0.0  ;;  %v881_v33 = vpop.permute.xlu1 %880  ;;  %v896_v19 = vpop.permute.xlu0 %895  ;;  %v824_v40 = vmul.f32 %v1210_v32, %v2019_v0  ;;  %v1212_v0 = vld [vmem:[#allocation2 + $0xd8] sm:$0xff] }
 0x203   :  { %1069 = vst [vmem:[#allocation5 + $0x50] sm:$0xff] %v1021_v36  ;;  %1070 = vst.msk [vmem:[#allocation5 + $0x58] sm:$0xff] %vm74_vm0, %v1022_v13  ;;  %v977_v9 = vadd.f32 %v881_v33, %v809_v4  ;;  %v978_v26 = vadd.f32 %v881_v33, %v810_v56  ;;  %v983_v11 = vadd.f32 %v896_v19, %v815_v44  ;;  %v1211_v4 = vld [vmem:[#allocation2 + $0xd0] sm:$0xff] }
 0x204   :  { %1075 = vst [vmem:[#allocation5 + $0x80] sm:$0xff] %v1027_v24  ;;  %1076 = vst.msk [vmem:[#allocation5 + $0x88] sm:$0xff] %vm74_vm0, %v1028_v60  ;;  %v984_v55 = vadd.f32 %v896_v19, %v816_v52  ;;  %v821_v16 = vmul.f32 %v1211_v4, %v2017_v38  ;;  %v822_v56 = vmul.f32 %v1212_v0, %v2017_v38  ;;  %v1226_v4 = vld [vmem:[#allocation2 + $0x168] sm:$0xff] }
 0x205   :  { %v1025_v59 = vmax.f32 %v977_v9, 0.0  ;;  %v1026_v1 = vmax.f32 %v978_v26, 0.0  ;;  %v1031_v31 = vmax.f32 %v983_v11, 0.0  ;;  %v827_v44 = vmul.f32 %v1213_v41, %v2023_v17 }
 0x206   :  { %v1032_v47 = vmax.f32 %v984_v55, 0.0  ;;  %v891_v63 = vpop.permute.xlu1 %890  ;;  %v906_v27 = vpop.permute.xlu0 %905  ;;  %v828_v52 = vmul.f32 %v1214_v35, %v2023_v17  ;;  %v1215_v55 = vld [vmem:[#allocation2 + $0xf0] sm:$0xff]  ;;  %v1216_v17 = vld [vmem:[#allocation2 + $0xf8] sm:$0xff] }
 0x207   :  { %1073 = vst [vmem:[#allocation5 + $0x70] sm:$0xff] %v1025_v59  ;;  %1074 = vst.msk [vmem:[#allocation5 + $0x78] sm:$0xff] %vm74_vm0, %v1026_v1  ;;  %v981_v57 = vadd.f32 %v891_v63, %v813_v5  ;;  %v982_v29 = vadd.f32 %v891_v63, %v814_v6  ;;  %v987_v18 = vadd.f32 %v906_v27, %v819_v42 }
 0x208   :  { %1079 = vst [vmem:[#allocation5 + $0xa0] sm:$0xff] %v1031_v31  ;;  %1080 = vst.msk [vmem:[#allocation5 + $0xa8] sm:$0xff] %vm74_vm0, %v1032_v47  ;;  %v988_v43 = vadd.f32 %v906_v27, %v820_v25  ;;  %v825_v20 = vmul.f32 %v1215_v55, %v2021_v14  ;;  %v826_v5 = vmul.f32 %v1216_v17, %v2021_v14 }
 0x209   :  { %v1029_v48 = vmax.f32 %v981_v57, 0.0  ;;  %v1030_v15 = vmax.f32 %v982_v29, 0.0  ;;  %v1035_v45 = vmax.f32 %v987_v18, 0.0  ;;  %v831_v6 = vmul.f32 %v1217_v23, %v2027_v54  ;;  %v1219_v29 = vld [vmem:[#allocation2 + $0x110] sm:$0xff] }
 0x20a   :  { %v1036_v30 = vmax.f32 %v988_v43, 0.0  ;;  %v901_v39 = vpop.permute.xlu1 %900  ;;  %v916_v2 = vpop.permute.xlu0 %915  ;;  %v832_v42 = vmul.f32 %v1218_v49, %v2027_v54  ;;  %v829_v18 = vmul.f32 %v1219_v29, %v2025_v10  ;;  %v1220_v54 = vld [vmem:[#allocation2 + $0x118] sm:$0xff] }
 0x20b   :  { %1077 = vst [vmem:[#allocation5 + $0x90] sm:$0xff] %v1029_v48  ;;  %1078 = vst.msk [vmem:[#allocation5 + $0x98] sm:$0xff] %vm74_vm0, %v1030_v15  ;;  %v985_v37 = vadd.f32 %v901_v39, %v817_v61  ;;  %v986_v22 = vadd.f32 %v901_v39, %v818_v21  ;;  %v991_v3 = vadd.f32 %v916_v2, %v823_v58 }
 0x20c   :  { %1083 = vst [vmem:[#allocation5 + $0xc0] sm:$0xff] %v1035_v45  ;;  %1084 = vst.msk [vmem:[#allocation5 + $0xc8] sm:$0xff] %vm74_vm0, %v1036_v30  ;;  %v992_v12 = vadd.f32 %v916_v2, %v824_v40  ;;  %v830_v43 = vmul.f32 %v1220_v54, %v2025_v10  ;;  %v835_v61 = vmul.f32 %v1221_v62, %v2031_v46  ;;  %v1223_v2 = vld [vmem:[#allocation2 + $0x130] sm:$0xff] }
 0x20d   :  { %v1033_v36 = vmax.f32 %v985_v37, 0.0  ;;  %v1034_v13 = vmax.f32 %v986_v22, 0.0  ;;  %v1039_v24 = vmax.f32 %v991_v3, 0.0  ;;  %v836_v21 = vmul.f32 %v1222_v53, %v2031_v46  ;;  %v1224_v46 = vld [vmem:[#allocation2 + $0x138] sm:$0xff]  ;;  %v1225_v3 = vld [vmem:[#allocation2 + $0x160] sm:$0xff] }
 0x20e   :  { %v1040_v60 = vmax.f32 %v992_v12, 0.0  ;;  %v911_v33 = vpop.permute.xlu1 %910  ;;  %v926_v19 = vpop.permute.xlu0 %925  ;;  %v833_v37 = vmul.f32 %v1223_v2, %v2029_v28  ;;  %v834_v22 = vmul.f32 %v1224_v46, %v2029_v28  ;;  %v839_v12 = vmul.f32 %v1225_v3, %v2035_v51 }
 0x20f   :  { %1081 = vst [vmem:[#allocation5 + $0xb0] sm:$0xff] %v1033_v36  ;;  %1082 = vst.msk [vmem:[#allocation5 + $0xb8] sm:$0xff] %vm74_vm0, %v1034_v13  ;;  %v989_v9 = vadd.f32 %v911_v33, %v821_v16  ;;  %v990_v38 = vadd.f32 %v911_v33, %v822_v56  ;;  %v995_v26 = vadd.f32 %v926_v19, %v827_v44 }
 0x210   :  { %1087 = vst [vmem:[#allocation5 + $0xe0] sm:$0xff] %v1039_v24  ;;  %1088 = vst.msk [vmem:[#allocation5 + $0xe8] sm:$0xff] %vm74_vm0, %v1040_v60  ;;  %v996_v11 = vadd.f32 %v926_v19, %v828_v52  ;;  %v840_v16 = vmul.f32 %v1226_v4, %v2035_v51  ;;  %v1227_v60 = vld [vmem:[#allocation2 + $0x150] sm:$0xff]  ;;  %v1228_v51 = vld [vmem:[#allocation2 + $0x158] sm:$0xff] }
 0x211   :  { %v1037_v8 = vmax.f32 %v989_v9, 0.0  ;;  %v1038_v25 = vmax.f32 %v990_v38, 0.0  ;;  %v1043_v59 = vmax.f32 %v995_v26, 0.0  ;;  %v837_v33 = vmul.f32 %v1227_v60, %v2033_v34 }
 0x212   :  { %v1044_v1 = vmax.f32 %v996_v11, 0.0  ;;  %v921_v31 = vpop.permute.xlu1 %920  ;;  %v936_v47 = vpop.permute.xlu0 %935  ;;  %v838_v19 = vmul.f32 %v1228_v51, %v2033_v34 }
 0x213   :  { %1085 = vst [vmem:[#allocation5 + $0xd0] sm:$0xff] %v1037_v8  ;;  %1086 = vst.msk [vmem:[#allocation5 + $0xd8] sm:$0xff] %vm74_vm0, %v1038_v25  ;;  %v993_v63 = vadd.f32 %v921_v31, %v825_v20  ;;  %v994_v14 = vadd.f32 %v921_v31, %v826_v5  ;;  %v999_v27 = vadd.f32 %v936_v47, %v831_v6  ;;  %v1229_v5 = vld [vmem:[#allocation2 + $0x170] sm:$0xff]  ;;  %v1230_v6 = vld [vmem:[#allocation2 + $0x178] sm:$0xff] }
 0x214   :  { %1091 = vst [vmem:[#allocation5 + $0x100] sm:$0xff] %v1043_v59  ;;  %1092 = vst.msk [vmem:[#allocation5 + $0x108] sm:$0xff] %vm74_vm0, %v1044_v1  ;;  %v1000_v57 = vadd.f32 %v936_v47, %v832_v42  ;;  %v841_v23 = vmul.f32 %v1229_v5, %v2039_v7  ;;  %v842_v49 = vmul.f32 %v1230_v6, %v2039_v7 }
 0x215   :  { %v1041_v50 = vmax.f32 %v993_v63, 0.0  ;;  %v1042_v58 = vmax.f32 %v994_v14, 0.0  ;;  %v1047_v32 = vmax.f32 %v999_v27, 0.0 }
 0x216   :  { %v1048_v40 = vmax.f32 %v1000_v57, 0.0  ;;  %v931_v48 = vpop.permute.xlu1 %930  ;;  %v946_v15 = vpop.permute.xlu0 %945 }
 0x217   :  { %1089 = vst [vmem:[#allocation5 + $0xf0] sm:$0xff] %v1041_v50  ;;  %1090 = vst.msk [vmem:[#allocation5 + $0xf8] sm:$0xff] %vm74_vm0, %v1042_v58  ;;  %v997_v45 = vadd.f32 %v931_v48, %v829_v18  ;;  %v998_v10 = vadd.f32 %v931_v48, %v830_v43  ;;  %v1003_v30 = vadd.f32 %v946_v15, %v835_v61 }
 0x218   :  { %1095 = vst [vmem:[#allocation5 + $0x120] sm:$0xff] %v1047_v32  ;;  %1096 = vst.msk [vmem:[#allocation5 + $0x128] sm:$0xff] %vm74_vm0, %v1048_v40  ;;  %v1004_v39 = vadd.f32 %v946_v15, %v836_v21 }
 0x219   :  { %v1045_v0 = vmax.f32 %v997_v45, 0.0  ;;  %v1046_v56 = vmax.f32 %v998_v10, 0.0  ;;  %v1051_v41 = vmax.f32 %v1003_v30, 0.0 }
 0x21a   :  { %v1052_v44 = vmax.f32 %v1004_v39, 0.0  ;;  %v941_v35 = vpop.permute.xlu1 %940  ;;  %v956_v52 = vpop.permute.xlu0 %955 }
 0x21b   :  { %1093 = vst [vmem:[#allocation5 + $0x110] sm:$0xff] %v1045_v0  ;;  %1094 = vst.msk [vmem:[#allocation5 + $0x118] sm:$0xff] %vm74_vm0, %v1046_v56  ;;  %v1001_v36 = vadd.f32 %v941_v35, %v833_v37  ;;  %v1002_v28 = vadd.f32 %v941_v35, %v834_v22  ;;  %v1007_v13 = vadd.f32 %v956_v52, %v839_v12 }
 0x21c   :  { %1099 = vst [vmem:[#allocation5 + $0x140] sm:$0xff] %v1051_v41  ;;  %1100 = vst.msk [vmem:[#allocation5 + $0x148] sm:$0xff] %vm74_vm0, %v1052_v44  ;;  %v1008_v24 = vadd.f32 %v956_v52, %v840_v16 }
 0x21d   :  { %v1049_v9 = vmax.f32 %v1001_v36, 0.0  ;;  %v1050_v38 = vmax.f32 %v1002_v28, 0.0  ;;  %v1055_v26 = vmax.f32 %v1007_v13, 0.0 }
 0x21e   :  { %v1056_v11 = vmax.f32 %v1008_v24, 0.0  ;;  %v951_v55 = vpop.permute.xlu1 %950 }
 0x21f   :  { %1097 = vst [vmem:[#allocation5 + $0x130] sm:$0xff] %v1049_v9  ;;  %1098 = vst.msk [vmem:[#allocation5 + $0x138] sm:$0xff] %vm74_vm0, %v1050_v38  ;;  %v1005_v20 = vadd.f32 %v951_v55, %v837_v33  ;;  %v1006_v17 = vadd.f32 %v951_v55, %v838_v19 }
 0x220   :  { %1103 = vst [vmem:[#allocation5 + $0x160] sm:$0xff] %v1055_v26  ;;  %1104 = vst.msk [vmem:[#allocation5 + $0x168] sm:$0xff] %vm74_vm0, %v1056_v11 }
 0x221   :  { %v1053_v34 = vmax.f32 %v1005_v20, 0.0  ;;  %v1054_v42 = vmax.f32 %v1006_v17, 0.0 }
 0x222   :  { %v961_v8 = vpop.permute.xlu1 %960 }
 0x223   :  { %1101 = vst [vmem:[#allocation5 + $0x150] sm:$0xff] %v1053_v34  ;;  %1102 = vst.msk [vmem:[#allocation5 + $0x158] sm:$0xff] %vm74_vm0, %v1054_v42  ;;  %v1009_v25 = vadd.f32 %v961_v8, %v841_v23  ;;  %v1010_v59 = vadd.f32 %v961_v8, %v842_v49 }
 0x225   :  { %v1057_v1 = vmax.f32 %v1009_v25, 0.0  ;;  %v1058_v31 = vmax.f32 %v1010_v59, 0.0 }
 0x227   :  { %1105 = vst [vmem:[#allocation5 + $0x170] sm:$0xff] %v1057_v1  ;;  %1106 = vst.msk [vmem:[#allocation5 + $0x178] sm:$0xff] %vm74_vm0, %v1058_v31 }
 0x228   :  { %1262 = shalt.err (!%p1259_p9)
}
 0x229   :  { %1118 = dma.vmem_to_hbm [thread:$0]  %s1113_s5, 6144, %s2119_s2, [#allocation4], %s1276_s12, %s1276_s12, %s1277_s13  }
 0x22a   :  { %1273 = dma.done.wait [#allocation4], 6144  }
 0x22b   :  { %1274 = vsyncadd [#allocation4], 4294961152 }
 0x22c   :  { %1122 = vsyncpa [#allocation3], 1 }
 0x22d   :  { %1123 = vsyncpa [#allocation4], 1 }

</bundles_post_ra>
